<compile_context>
chip_gen: v6e
topology: v6e:2x2x1
jax: 0.10.0
libtpu: 0.0.40
codegen_flags: <defaults>
</compile_context>

<pallas_src>
import jax
import jax.numpy as jnp
from jax.experimental import pallas as pl
from jax.experimental.pallas import tpu as pltpu


def _word_embedding_kernel(idx_ref, table_ref, pe_ref, out_ref):
    # idx_ref:   VMEM (ts, 1) int32   -- token ids for this (seq-tile, batch) step
    # table_ref: VMEM (V, E)  f32     -- full embedding table (resident, 1 buffer)
    # pe_ref:    VMEM (ts, E) f32     -- positional-encoding rows of this seq tile
    # out_ref:   VMEM (ts, E)         -- output tile (batch dim squeezed)
    ts = out_ref.shape[0]
    V = table_ref.shape[0]

    ids = idx_ref[...]                                           # (ts, 1)
    vocab_iota = jax.lax.broadcasted_iota(jnp.int32, (ts, V), 1)  # vocab along lanes
    onehot = (ids == vocab_iota).astype(table_ref.dtype)         # (ts, V) exact 1.0/0.0

    # Row gather as one MXU matmul (exact for 0/1 multipliers, f32 accumulate).
    gathered = jnp.dot(onehot, table_ref[...], preferred_element_type=jnp.float32)

    # Fused positional-encoding add + single dense store (f32 math, cast at store).
    out_ref[...] = (gathered + pe_ref[...].astype(jnp.float32)).astype(out_ref.dtype)


def make_positional_encoding(embed_size, max_len):
    """Matches PositionalEmbedding.__init__ (sin on even lanes, cos on odd lanes)."""
    pos = jnp.arange(max_len, dtype=jnp.float32)[:, None]
    _2i = jnp.arange(0, embed_size, 2, dtype=jnp.float32)
    div = jnp.power(10000.0, _2i / embed_size)
    enc = jnp.zeros((max_len, embed_size), dtype=jnp.float32)
    enc = enc.at[:, 0::2].set(jnp.sin(pos / div))
    enc = enc.at[:, 1::2].set(jnp.cos(pos / div))
    return enc


def word_embedding_forward(indices, emb_table, pos_encoding, *, max_seq_tile=512):
    """indices: (B, S) int, emb_table: (V, E) f32, pos_encoding: (max_len, E) f32
       -> (B, S, E) f32 = emb_table[indices] + pos_encoding[:S]."""
    B, S = indices.shape
    V, E = emb_table.shape
    max_len, E2 = pos_encoding.shape
    assert E == E2, "embed dims must match"
    assert S <= max_len, "sequence longer than positional table"

    table_bytes = V * E * jnp.dtype(emb_table.dtype).itemsize
    if table_bytes > 48 * 1024 * 1024:
        # TODO(synk): over-budget tables -> table with memory_space=pl.ANY and a
        # deeply multi-buffered per-row pltpu.make_async_copy gather (8-16
        # outstanding row DMAs per tile) instead of the VMEM-resident path.
        raise NotImplementedError("embedding table too large for VMEM-resident path")

    # Pad sequence to a sublane multiple; pick the largest tile that divides it
    # while keeping the in-kernel (ts, V) one-hot around <= 1 MiB of vregs.
    s_pad = -(-S // 8) * 8
    onehot_cap = max(8, (((1 << 20) // max(V * 4, 1)) // 8) * 8)
    ts = min(s_pad, max(8, (max_seq_tile // 8) * 8), onehot_cap)
    while s_pad % ts != 0:
        ts -= 8

    # nn.Embedding would raise on out-of-range ids; we clamp instead (documented
    # deviation, avoids any OOB access).  Padded positions gather row 0 and are
    # sliced away below.
    idx = jnp.clip(indices.astype(jnp.int32), 0, V - 1)
    if s_pad != S:
        idx = jnp.pad(idx, ((0, 0), (0, s_pad - S)))
    idx3 = idx.reshape(B, s_pad, 1)

    pe = pos_encoding.astype(jnp.float32)
    if max_len < s_pad:
        pe = jnp.pad(pe, ((0, s_pad - max_len), (0, 0)))
    else:
        pe = pe[:s_pad]

    # Explicit VMEM budget: single-buffered table + tiles + headroom.
    vmem_limit = int(min(100 * 1024 * 1024,
                         max(32 * 1024 * 1024, table_bytes + (16 << 20))))

    def run(single_buffer_table):
        table_kwargs = {}
        if single_buffer_table:
            # Grid-invariant operand: one buffer is enough (halves its footprint).
            table_kwargs = dict(pipeline_mode=pl.Buffered(1))
        in_specs = [
            # Per-tile token ids (batch dim squeezed) -> kernel sees (ts, 1).
            pl.BlockSpec((None, ts, 1), lambda j, b: (b, j, 0)),
            # Whole embedding table, VMEM-resident (constant block index).
            pl.BlockSpec((V, E), lambda j, b: (0, 0), **table_kwargs),
            # PE rows for this seq tile; batch is the inner grid axis, so each
            # PE tile is fetched once, not once per batch element.
            pl.BlockSpec((ts, E), lambda j, b: (j, 0)),
        ]
        out_specs = pl.BlockSpec((None, ts, E), lambda j, b: (b, j, 0))
        grid_spec = pltpu.PrefetchScalarGridSpec(
            num_scalar_prefetch=0,
            grid=(s_pad // ts, B),
            in_specs=in_specs,
            out_specs=out_specs,
        )
        return pl.pallas_call(
            _word_embedding_kernel,
            out_shape=jax.ShapeDtypeStruct((B, s_pad, E), emb_table.dtype),
            grid_spec=grid_spec,
            compiler_params=pltpu.CompilerParams(
                dimension_semantics=("parallel", "parallel"),
                vmem_limit_bytes=vmem_limit,
            ),
        )(idx3, emb_table, pe)

    try:
        out = run(single_buffer_table=True)
    except Exception:
        # Fallback if this Pallas version rejects pipeline_mode on BlockSpec:
        # same kernel with the default (double-buffered) invariant table.
        out = run(single_buffer_table=False)

    return out[:, :S, :]


if __name__ == "__main__":
    # Module hyperparameters (BERT=False branch): nn.Embedding(vocab_size, embed_size)
    vocab_size = 64
    embed_size = 128
    max_len = 16
    B, S = 2, 8

    key = jax.random.PRNGKey(0)
    k_emb, k_idx = jax.random.split(key)

    # torch.nn.init.normal_(weight, mean=0, std=0.02)
    emb_table = 0.02 * jax.random.normal(k_emb, (vocab_size, embed_size), dtype=jnp.float32)
    indices = jax.random.randint(k_idx, (B, S), 0, vocab_size, dtype=jnp.int32)
    pos_encoding = make_positional_encoding(embed_size, max_len)

    out = word_embedding_forward(indices, emb_table, pos_encoding)
    out = jax.block_until_ready(out)

    # Reference: plain JAX gather + positional add (same semantics as the module).
    ref = jnp.take(emb_table, indices, axis=0) + pos_encoding[:S, :][None, :, :]
    assert out.shape == (B, S, embed_size)
    assert jnp.allclose(out, ref, atol=1e-6), "Pallas WordEmbedding mismatch"

    print("KERNEL_OK")
</pallas_src>

<mosaic_0001>
module attributes {stable_mosaic.version = 11 : i64} {
  func.func @_word_embedding_kernel(%arg0: i32, %arg1: i32, %arg2: memref<1x8x1xi32, #tpu.memory_space<vmem>>, %arg3: memref<64x128xf32, #tpu.memory_space<vmem>>, %arg4: memref<8x128xf32, #tpu.memory_space<vmem>>, %arg5: memref<1x8x128xf32, #tpu.memory_space<vmem>>) attributes {dimension_semantics = [#tpu.dimension_semantics<parallel>, #tpu.dimension_semantics<parallel>], iteration_bounds = array<i64: 1, 2>, scalar_prefetch = 0 : i64, scratch_operands = 0 : i64, tpu.core_type = #tpu.core_type<tc>, window_params = [{transform_indices = @transform_0, window_bounds = array<i64: 1, 8, 1>}, {pipeline_mode = #tpu.pipeline_mode<synchronous>, transform_indices = @transform_1, window_bounds = array<i64: 64, 128>}, {transform_indices = @transform_2, window_bounds = array<i64: 8, 128>}, {transform_indices = @transform_3, window_bounds = array<i64: 1, 8, 128>}]} {
    %c0 = arith.constant 0 : index
    %c0_0 = arith.constant 0 : index
    %c0_1 = arith.constant 0 : index
    %0 = vector.load %arg2[%c0, %c0_0, %c0_1] : memref<1x8x1xi32, #tpu.memory_space<vmem>>, vector<1x8x1xi32>
    %1 = vector.shape_cast %0 : vector<1x8x1xi32> to vector<8x1xi32>
    %2 = tpu.iota {dimensions = array<i32: 1>} : vector<8x64xi32>
    %3 = vector.broadcast %1 : vector<8x1xi32> to vector<8x64xi32>
    %4 = arith.cmpi eq, %3, %2 : vector<8x64xi32>
    %5 = arith.extui %4 : vector<8x64xi1> to vector<8x64xi32>
    %6 = arith.sitofp %5 : vector<8x64xi32> to vector<8x64xf32>
    %c0_2 = arith.constant 0 : index
    %c0_3 = arith.constant 0 : index
    %7 = vector.load %arg3[%c0_2, %c0_3] : memref<64x128xf32, #tpu.memory_space<vmem>>, vector<64x128xf32>
    %cst = arith.constant dense<0.000000e+00> : vector<8x128xf32>
    %8 = tpu.matmul %6, %7, %cst {dimension_numbers = #tpu.dot_dimension_numbers<[1], [0], [0], [1], [0, 0, 1, 1], [], []>} : vector<8x64xf32>, vector<64x128xf32>, vector<8x128xf32> -> vector<8x128xf32>
    %c0_4 = arith.constant 0 : index
    %c0_5 = arith.constant 0 : index
    %9 = vector.load %arg4[%c0_4, %c0_5] : memref<8x128xf32, #tpu.memory_space<vmem>>, vector<8x128xf32>
    %10 = arith.addf %8, %9 : vector<8x128xf32>
    %c0_6 = arith.constant 0 : index
    %c0_7 = arith.constant 0 : index
    %c0_8 = arith.constant 0 : index
    %11 = vector.load %arg5[%c0_6, %c0_7, %c0_8] : memref<1x8x128xf32, #tpu.memory_space<vmem>>, vector<1x8x128xf32>
    %12 = vector.shape_cast %11 : vector<1x8x128xf32> to vector<8x128xf32>
    %13 = vector.shape_cast %10 : vector<8x128xf32> to vector<1x8x128xf32>
    tpu.vector_store %arg5[%c0_6, %c0_7, %c0_8], %13 {strides = array<i32>} : memref<1x8x128xf32, #tpu.memory_space<vmem>>, vector<1x8x128xf32>,
    return
  }
  func.func @transform_0(%arg0: i32, %arg1: i32) -> (i32, i32, i32) {
    %c0_i32 = arith.constant 0 : i32
    %c0_i32_0 = arith.constant 0 : i32
    return %arg1, %arg0, %c0_i32 : i32, i32, i32
  }
  func.func @transform_1(%arg0: i32, %arg1: i32) -> (i32, i32) {
    %c0_i32 = arith.constant 0 : i32
    %c0_i32_0 = arith.constant 0 : i32
    %c0_i32_1 = arith.constant 0 : i32
    return %c0_i32, %c0_i32_0 : i32, i32
  }
  func.func @transform_2(%arg0: i32, %arg1: i32) -> (i32, i32) {
    %c0_i32 = arith.constant 0 : i32
    %c0_i32_0 = arith.constant 0 : i32
    return %arg0, %c0_i32 : i32, i32
  }
  func.func @transform_3(%arg0: i32, %arg1: i32) -> (i32, i32, i32) {
    %c0_i32 = arith.constant 0 : i32
    %c0_i32_0 = arith.constant 0 : i32
    return %arg1, %arg0, %c0_i32 : i32, i32, i32
  }
}

module attributes {stable_mosaic.version = 11 : i64} {
  func.func @_word_embedding_kernel(%arg0: i32, %arg1: i32, %arg2: memref<1x8x1xi32, #tpu.memory_space<vmem>>, %arg3: memref<64x128xf32, #tpu.memory_space<vmem>>, %arg4: memref<8x128xf32, #tpu.memory_space<vmem>>, %arg5: memref<1x8x128xf32, #tpu.memory_space<vmem>>) attributes {dimension_semantics = [#tpu.dimension_semantics<parallel>, #tpu.dimension_semantics<parallel>], iteration_bounds = array<i64: 1, 2>, scalar_prefetch = 0 : i64, scratch_operands = 0 : i64, tpu.core_type = #tpu.core_type<tc>, window_params = [{transform_indices = @transform_0, window_bounds = array<i64: 1, 8, 1>}, {pipeline_mode = #tpu.pipeline_mode<synchronous>, transform_indices = @transform_1, window_bounds = array<i64: 64, 128>}, {transform_indices = @transform_2, window_bounds = array<i64: 8, 128>}, {transform_indices = @transform_3, window_bounds = array<i64: 1, 8, 128>}]} {
    %c0 = arith.constant 0 : index
    %c0_0 = arith.constant 0 : index
    %c0_1 = arith.constant 0 : index
    %0 = vector.load %arg2[%c0, %c0_0, %c0_1] : memref<1x8x1xi32, #tpu.memory_space<vmem>>, vector<1x8x1xi32>
    %1 = vector.shape_cast %0 : vector<1x8x1xi32> to vector<8x1xi32>
    %2 = tpu.iota {dimensions = array<i32: 1>} : vector<8x64xi32>
    %3 = vector.broadcast %1 : vector<8x1xi32> to vector<8x64xi32>
    %4 = arith.cmpi eq, %3, %2 : vector<8x64xi32>
    %5 = arith.extui %4 : vector<8x64xi1> to vector<8x64xi32>
    %6 = arith.sitofp %5 : vector<8x64xi32> to vector<8x64xf32>
    %c0_2 = arith.constant 0 : index
    %c0_3 = arith.constant 0 : index
    %7 = vector.load %arg3[%c0_2, %c0_3] : memref<64x128xf32, #tpu.memory_space<vmem>>, vector<64x128xf32>
    %cst = arith.constant dense<0.000000e+00> : vector<8x128xf32>
    %8 = tpu.matmul %6, %7, %cst {dimension_numbers = #tpu.dot_dimension_numbers<[1], [0], [0], [1], [0, 0, 1, 1], [], []>} : vector<8x64xf32>, vector<64x128xf32>, vector<8x128xf32> -> vector<8x128xf32>
    %c0_4 = arith.constant 0 : index
    %c0_5 = arith.constant 0 : index
    %9 = vector.load %arg4[%c0_4, %c0_5] : memref<8x128xf32, #tpu.memory_space<vmem>>, vector<8x128xf32>
    %10 = arith.addf %8, %9 : vector<8x128xf32>
    %c0_6 = arith.constant 0 : index
    %c0_7 = arith.constant 0 : index
    %c0_8 = arith.constant 0 : index
    %11 = vector.load %arg5[%c0_6, %c0_7, %c0_8] : memref<1x8x128xf32, #tpu.memory_space<vmem>>, vector<1x8x128xf32>
    %12 = vector.shape_cast %11 : vector<1x8x128xf32> to vector<8x128xf32>
    %13 = vector.shape_cast %10 : vector<8x128xf32> to vector<1x8x128xf32>
    tpu.vector_store %arg5[%c0_6, %c0_7, %c0_8], %13 {strides = array<i32>} : memref<1x8x128xf32, #tpu.memory_space<vmem>>, vector<1x8x128xf32>,
    return
  }
  func.func @transform_0(%arg0: i32, %arg1: i32) -> (i32, i32, i32) {
    %c0_i32 = arith.constant 0 : i32
    %c0_i32_0 = arith.constant 0 : i32
    return %arg1, %arg0, %c0_i32 : i32, i32, i32
  }
  func.func @transform_1(%arg0: i32, %arg1: i32) -> (i32, i32) {
    %c0_i32 = arith.constant 0 : i32
    %c0_i32_0 = arith.constant 0 : i32
    %c0_i32_1 = arith.constant 0 : i32
    return %c0_i32, %c0_i32_0 : i32, i32
  }
  func.func @transform_2(%arg0: i32, %arg1: i32) -> (i32, i32) {
    %c0_i32 = arith.constant 0 : i32
    %c0_i32_0 = arith.constant 0 : i32
    return %arg0, %c0_i32 : i32, i32
  }
  func.func @transform_3(%arg0: i32, %arg1: i32) -> (i32, i32, i32) {
    %c0_i32 = arith.constant 0 : i32
    %c0_i32_0 = arith.constant 0 : i32
    return %arg1, %arg0, %c0_i32 : i32, i32, i32
  }
}

</mosaic_0001>

<bundles_post_ra>
// kernel: tpu_custom_call.1
= control target key start
LH: loop header
LB: loop body
LE: loop exit
PB: predicated region body
PF: predicated region fallthrough
CT: control target
= control target key end

     0   :  { %8 = vsyncpa [#allocation3], 0  ;;  %s809_s0 = inlined_call_operand.vmem [shape: s32[2,8,1], index: 0, kind: input, shape index: {}]   ;;  %s810_s1 = inlined_call_operand.hbm [shape: f32[64,128], index: 1, kind: input, shape index: {}]   ;;  %s811_s2 = inlined_call_operand.vmem [shape: f32[8,128], index: 2, kind: input, shape index: {}]   ;;  %s812_s3 = inlined_call_operand.hbm [shape: f32[2,8,128], index: 3, kind: output, shape index: {}]  }
   0x1   :  { %9 = vsyncpa [#allocation4], 0 }
   0x2   :  { %11 = vsyncpa [#allocation4 + $0x1], 0  ;;  %s680_s12 = smov 0   ;;  %s682_s13 = smov 0  }
   0x3   :  { %s684_s14 = smov 0   ;;  %s686_s15 = smov 0  }
   0x4   :  { %s688_s16 = smov 0   ;;  %s690_s17 = smov 0  }
   0x5 LB: > { %s429_s18 = sadd.s32 4294967295, %s651_s17   ;;  %s430_s19 = sadd.s32 4294967294, %s651_s17   ;;  %s651_s17 = sphi %s690_s17, %s17_s17   ;;  %s647_s16 = sphi %s688_s16, %s821_s16   ;;  %s643_s15 = sphi %s686_s15, %s820_s15   ;;  %s639_s14 = sphi %s684_s14, %s819_s14   ;;  %s635_s13 = sphi %s682_s13, %s818_s13   ;;  %s631_s12 = sphi %s680_s12, %s817_s12  }
   0x6   : > { %s26_s20 = sadd.s32 1, %s647_s16  ;;  %s113_s21 = sadd.s32 1, %s639_s14 }
   0x7   : > { %p27_p0 = scmp.ge.s32.totalorder %s26_s20, 2  ;;  %p123_p1 = scmp.ne.s32.totalorder %s639_s14, %s635_s13 }
   0x8   : > { %p124_p2 = scmp.eq.s32.totalorder %s429_s18, 1  ;;  %p129_p3 = scmp.ne.s32.totalorder %s635_s13, %s631_s12 }
   0x9   : > { %s823_s20 = smov (%p27_p0, %s26_s20), 0  ;;  %p130_p5 = scmp.eq.s32.totalorder %s430_s19, 1 }
   0xa   : > { %p720_p4 = por %p124_p2, %p123_p1  ;;  %s108_s23 = ssub.s32 %s647_s16, %s823_s20 }
   0xb   : > { %p431_p6 = scmp.ge.s32.totalorder %s651_s17, 1  ;;  %p111_p7 = scmp.eq.s32.totalorder %s108_s23, 0 }
   0xc   : > { %p727_p8 = por %p130_p5, %p129_p3  ;;  %p137_p9 = scmp.lt.s32.totalorder %s651_s17, 3 }
   0xd   : > { %s733_s25 = scalar_select %p111_p7, %s639_s14, %s113_s21  }
   0xe   : > { %p735_p10 = pnand %p431_p6, %p137_p9  ;;  %p739_p11 = scmp.eq.s32.totalorder %s429_s18, 0 }
   0xf   : > { %s653_s28 = smov [#allocation2]  }
  0x10   : > { %p479_p12 = pneg %p735_p10  ;;  %s149_s29 = sshll.u32 %s653_s28, 4  ;;  %s150_s29 = int_to_ptr.vmem [resolvable:$true] %s149_s29 }
  0x11   : > { %s556_s30 = scalar_lea.vmem %s150_s29, 1024  ;;  %p564_p5 = scmp.lt.s32.totalorder %s150_s29, %s150_s29 }
  0x12   : > { %p480_p13 = pnand %p739_p11, %p479_p12  ;;  %p557_p1 = scmp.ne.s32.totalorder %s150_s29, %s556_s30 }
  0x13   : > { %p565_p6 = scmp.lt.s32.totalorder %s556_s30, %s556_s30 }
  0x14   : > { %p547_p0 = pneg %p480_p13 }
  0x15   : > { %p566_p7 = por %p565_p6, %p564_p5 }
  0x16   : > { %p559_p2 = pnand %p557_p1, %p547_p0 }
  0x18   : > { %p560_p3 = pneg %p559_p2 }
  0x1a   : > { %p567_p9 = pnand %p566_p7, %p560_p3 }
  0x1c   : > { %570 = shalt.err (!%p567_p9)
}
  0x1d   : > { %s654_s4 = smov 128   ;;  %s655_s5 = smov 8  }
  0x1e   : > { %482 = dma.hbm_to_vmem [thread:$0]  (!%p480_p13), %s810_s1, 1024, %s150_s29, [#allocation3], %s654_s4, %s654_s4, %s655_s5  }
  0x1f   : > { %182 = sbr.rel (%p735_p10) target bundleno = 378 (0x17a), region = 32 }
  0x24   : > { %622 = dma.done.wait (%p739_p11), [#allocation3], 1024  }
  0x25   : > { %624 = vsyncadd (%p739_p11), [#allocation3], 4294966272  ;;  %p212_p12 = scmp.lt.s32.totalorder %s643_s15, 1  ;;  %v656_v0 = vmov 0   ;;  %v657_v1 = vmov 0.0   ;;  %vm658_vm0 = vmmov 0   ;;  %v224_v11 = vlaneseq }
  0x26   : > { %544 = vset.pattern.permute.xlu0 %v656_v0  ;;  %454 = vmatprep.subr.mxu0 %v657_v1  ;;  %v239_v3 = vld [vmem:[#allocation2 + $0x38] sm:$0xff]  ;;  %v238_v4 = vld [vmem:[#allocation2 + $0x30] sm:$0xff]  ;;  %v237_v5 = vld [vmem:[#allocation2 + $0x28] sm:$0xff]  ;;  %vm241_vm1 = vcmask 523264   ;;  %s209_s19 = sand.u32 1, %s635_s13   ;;  %s442_s27 = sshll.u32 %s643_s15, 7 }
  0x27   : > { %s213_s8 = scalar_select %p212_p12, %s643_s15, 1  ;;  %470 = vmatprep.mubr.msk.f32.mxu0 %vm658_vm0, %v657_v1  ;;  %455 = vmatpush3.msra.mxu0 %v239_v3  ;;  %v236_v6 = vld [vmem:[#allocation2 + $0x20] sm:$0xff]  ;;  %v235_v7 = vld [vmem:[#allocation2 + $0x18] sm:$0xff]  ;;  %v234_v8 = vld [vmem:[#allocation2 + $0x10] sm:$0xff]  ;;  %v225_v12 = vand.u32 127, %v224_v11 }
  0x28   : > { %456 = vmatprep.subr.mxu0 %v657_v1  ;;  %v233_v9 = vld [vmem:[#allocation2 + $0x8] sm:$0xff]  ;;  %v232_v10 = vld [vmem:[#allocation2] sm:$0xff]  ;;  %s437_s21 = sshll.u32 %s209_s19, 3  ;;  %s769_s5 = scalar_lea.hbm %s812_s3, %s442_s27 }
  0x29   : > { %s438_s9 = sshll.u32 %s213_s8, 3  ;;  %457 = vmatpush3.msra.mxu0 %v238_v4  ;;  %v240_v15 = vld [vmem:[%s811_s2] sm:$0xff]  ;;  %s211_s28 = scalar_lea.vmem [#allocation5], %s437_s21 }
  0x2a   : > { %s218_s18 = scalar_lea.vmem %s809_s0, %s438_s9  ;;  %458 = vmatprep.subr.mxu0 %v657_v1  ;;  %s331_s29 = sshll.u32 %s211_s28, 4  ;;  %s332_s29 = int_to_ptr.vmem [resolvable:$true] %s331_s29 }
  0x2b   : > { %v223_v2 = vld [vmem:[%s218_s18] sm:$0xff]  ;;  %459 = vmatpush3.msra.mxu0 %v237_v5  ;;  %s317_s6 = scalar_lea.sflag [#allocation4], %s209_s19  ;;  %s571_s7 = scalar_lea.vmem %s332_s29, 128 }
  0x2c   : > { %227 = vperm.xlu0 %544, %v223_v2   ;;  %460 = vmatprep.subr.mxu0 %v657_v1  ;;  %p572_p10 = scmp.ne.s32.totalorder %s332_s29, %s571_s7  ;;  %s659_s8 = smov [#allocation5]  }
  0x2d   : > { %461 = vmatpush3.msra.mxu0 %v236_v6  ;;  %s575_s15 = sshll.u32 %s659_s8, 4  ;;  %s576_s15 = int_to_ptr.vmem [resolvable:$false] %s575_s15 }
  0x2e   : > { %462 = vmatprep.subr.mxu0 %v657_v1  ;;  %p573_p11 = pnand %p572_p10, %p720_p4  ;;  %s577_s9 = scalar_lea.vmem %s576_s15, 256 }
  0x2f   : > { %463 = vmatpush3.msra.mxu0 %v235_v7  ;;  %p578_p0 = scmp.lt.s32.totalorder %s332_s29, %s576_s15  ;;  %p579_p1 = scmp.lt.s32.totalorder %s577_s9, %s571_s7 }
  0x30   : > { %464 = vmatprep.subr.mxu0 %v657_v1  ;;  %p574_p13 = pneg %p573_p11 }
  0x31   : > { %465 = vmatpush3.msra.mxu0 %v234_v8  ;;  %p580_p2 = por %p579_p1, %p578_p0 }
  0x32   : > { %466 = vmatprep.subr.mxu0 %v657_v1 }
  0x33   : > { %467 = vmatpush3.msra.mxu0 %v233_v9  ;;  %p581_p3 = pnand %p580_p2, %p574_p13 }
  0x34   : > { %468 = vmatprep.subr.mxu0 %v657_v1 }
  0x35   : > { %469 = vmatpush3.msra.mxu0 %v232_v10 }
  0xa7   : > { %v228_v13 = vpop.permute.xlu0 %227 }
  0xa8   : > { %vm229_vm2 = vcmp.eq.s32.totalorder %v228_v13, %v225_v12 }
  0xa9   : > { %v439_v14 = vsel %vm229_vm2, 1.0, %v657_v1 }
  0xaa   : > { %471 = vmatmul.mubr.msk.f32.vlgmr.msra.gmra.mxu0 %vm241_vm1, %v439_v14 }
 0x16a   : > { %v311_v16 = vpop.f32.mrf.mxu0 }
 0x16b   : > { %v312_v17 = vadd.f32 %v311_v16, %v240_v15 }
 0x16c   : > { %v472_v18 = vpop.f32.mrf.mxu0 }
 0x16d   : > { %315 = vst [vmem:[%s211_s28] sm:$0xff] %v312_v17 }
 0x16e   : > { %584 = shalt.err (!%p581_p3)
}
 0x16f   : > { %s585_s10 = scalar_lea.hbm %s769_s5, 128  ;;  %s589_s19 = scalar_lea.hbm %s812_s3, 256 }
 0x170   : > { %p586_p5 = scmp.ne.s32.totalorder %s769_s5, %s585_s10  ;;  %p590_p9 = scmp.lt.s32.totalorder %s769_s5, %s812_s3 }
 0x171   : > { %p591_p12 = scmp.lt.s32.totalorder %s589_s19, %s585_s10 }
 0x172   : > { %p587_p6 = pnand %p586_p5, %p720_p4 }
 0x173   : > { %p592_p10 = por %p591_p12, %p590_p9 }
 0x174   : > { %p588_p7 = pneg %p587_p6 }
 0x176   : > { %p593_p11 = pnand %p592_p10, %p588_p7 }
 0x178   : > { %596 = shalt.err (!%p593_p11)
}
 0x179   : > { %477 = dma.vmem_to_hbm [thread:$0]  (%p720_p4), %s332_s29, 128, %s769_s5, %s317_s6  }
 0x17a PF: > { %p489_p13 = scmp.ge.s32.totalorder %s651_s17, 2  ;;  %s343_s26 = sand.u32 1, %s631_s12  }
 0x17b   : > { %s344_s27 = scalar_lea.sflag [#allocation4], %s343_s26 }
 0x17c   : > { %p484_p0 = pnand %p489_p13, %p727_p8 }
 0x17e   : > { %p485_p1 = pneg %p484_p0 }
 0x180   : > { %626 = dma.done.wait (%p485_p1), %s344_s27, 128  }
 0x181   : > { %628 = vsyncadd (%p485_p1), %s344_s27, 4294967168  ;;  %s17_s17 = sadd.s32 1, %s651_s17   ;;  %s817_s12 = smov %s635_s13 }
 0x182   : > { %p14_p2 = scmp.ge.s32.totalorder %s17_s17, 4   ;;  %s818_s13 = smov %s639_s14 }
 0x183   : > { %s819_s14 = smov %s733_s25  ;;  %s820_s15 = smov %s647_s16 }
 0x184   : > { %s821_s16 = smov %s823_s20  ;;  %16 = sbr.rel (!%p14_p2) target bundleno = 5 (0x5), region = 75 }
 0x189   :  { %349 = vsyncpa [#allocation3], 1 }
 0x18a   :  { %351 = vsyncpa [#allocation3 + $0x1], 1 }
 0x18b   :  { %352 = vsyncpa [#allocation4], 1 }
 0x18c   :  { %354 = vsyncpa [#allocation4 + $0x1], 1 }

// kernel: tpu_custom_call.1
= control target key start
LH: loop header
LB: loop body
LE: loop exit
PB: predicated region body
PF: predicated region fallthrough
CT: control target
= control target key end

     0   :  { %8 = vsyncpa [#allocation3], 0  ;;  %s809_s0 = inlined_call_operand.vmem [shape: s32[2,8,1], index: 0, kind: input, shape index: {}]   ;;  %s810_s1 = inlined_call_operand.hbm [shape: f32[64,128], index: 1, kind: input, shape index: {}]   ;;  %s811_s2 = inlined_call_operand.vmem [shape: f32[8,128], index: 2, kind: input, shape index: {}]   ;;  %s812_s3 = inlined_call_operand.hbm [shape: f32[2,8,128], index: 3, kind: output, shape index: {}]  }
   0x1   :  { %9 = vsyncpa [#allocation4], 0 }
   0x2   :  { %11 = vsyncpa [#allocation4 + $0x1], 0  ;;  %s680_s12 = smov 0   ;;  %s682_s13 = smov 0  }
   0x3   :  { %s684_s14 = smov 0   ;;  %s686_s15 = smov 0  }
   0x4   :  { %s688_s16 = smov 0   ;;  %s690_s17 = smov 0  }
   0x5 LB: > { %s429_s18 = sadd.s32 4294967295, %s651_s17   ;;  %s430_s19 = sadd.s32 4294967294, %s651_s17   ;;  %s651_s17 = sphi %s690_s17, %s17_s17   ;;  %s647_s16 = sphi %s688_s16, %s821_s16   ;;  %s643_s15 = sphi %s686_s15, %s820_s15   ;;  %s639_s14 = sphi %s684_s14, %s819_s14   ;;  %s635_s13 = sphi %s682_s13, %s818_s13   ;;  %s631_s12 = sphi %s680_s12, %s817_s12  }
   0x6   : > { %s26_s20 = sadd.s32 1, %s647_s16  ;;  %s113_s21 = sadd.s32 1, %s639_s14 }
   0x7   : > { %p27_p0 = scmp.ge.s32.totalorder %s26_s20, 2  ;;  %p123_p1 = scmp.ne.s32.totalorder %s639_s14, %s635_s13 }
   0x8   : > { %p124_p2 = scmp.eq.s32.totalorder %s429_s18, 1  ;;  %p129_p3 = scmp.ne.s32.totalorder %s635_s13, %s631_s12 }
   0x9   : > { %s823_s20 = smov (%p27_p0, %s26_s20), 0  ;;  %p130_p5 = scmp.eq.s32.totalorder %s430_s19, 1 }
   0xa   : > { %p720_p4 = por %p124_p2, %p123_p1  ;;  %s108_s23 = ssub.s32 %s647_s16, %s823_s20 }
   0xb   : > { %p431_p6 = scmp.ge.s32.totalorder %s651_s17, 1  ;;  %p111_p7 = scmp.eq.s32.totalorder %s108_s23, 0 }
   0xc   : > { %p727_p8 = por %p130_p5, %p129_p3  ;;  %p137_p9 = scmp.lt.s32.totalorder %s651_s17, 3 }
   0xd   : > { %s733_s25 = scalar_select %p111_p7, %s639_s14, %s113_s21  }
   0xe   : > { %p735_p10 = pnand %p431_p6, %p137_p9  ;;  %p739_p11 = scmp.eq.s32.totalorder %s429_s18, 0 }
   0xf   : > { %s653_s28 = smov [#allocation2]  }
  0x10   : > { %p479_p12 = pneg %p735_p10  ;;  %s149_s29 = sshll.u32 %s653_s28, 4  ;;  %s150_s29 = int_to_ptr.vmem [resolvable:$true] %s149_s29 }
  0x11   : > { %s556_s30 = scalar_lea.vmem %s150_s29, 1024  ;;  %p564_p5 = scmp.lt.s32.totalorder %s150_s29, %s150_s29 }
  0x12   : > { %p480_p13 = pnand %p739_p11, %p479_p12  ;;  %p557_p1 = scmp.ne.s32.totalorder %s150_s29, %s556_s30 }
  0x13   : > { %p565_p6 = scmp.lt.s32.totalorder %s556_s30, %s556_s30 }
  0x14   : > { %p547_p0 = pneg %p480_p13 }
  0x15   : > { %p566_p7 = por %p565_p6, %p564_p5 }
  0x16   : > { %p559_p2 = pnand %p557_p1, %p547_p0 }
  0x18   : > { %p560_p3 = pneg %p559_p2 }
  0x1a   : > { %p567_p9 = pnand %p566_p7, %p560_p3 }
  0x1c   : > { %570 = shalt.err (!%p567_p9)
}
  0x1d   : > { %s654_s4 = smov 128   ;;  %s655_s5 = smov 8  }
  0x1e   : > { %482 = dma.hbm_to_vmem [thread:$0]  (!%p480_p13), %s810_s1, 1024, %s150_s29, [#allocation3], %s654_s4, %s654_s4, %s655_s5  }
  0x1f   : > { %182 = sbr.rel (%p735_p10) target bundleno = 378 (0x17a), region = 32 }
  0x24   : > { %622 = dma.done.wait (%p739_p11), [#allocation3], 1024  }
  0x25   : > { %624 = vsyncadd (%p739_p11), [#allocation3], 4294966272  ;;  %p212_p12 = scmp.lt.s32.totalorder %s643_s15, 1  ;;  %v656_v0 = vmov 0   ;;  %v657_v1 = vmov 0.0   ;;  %vm658_vm0 = vmmov 0   ;;  %v224_v11 = vlaneseq }
  0x26   : > { %544 = vset.pattern.permute.xlu0 %v656_v0  ;;  %454 = vmatprep.subr.mxu0 %v657_v1  ;;  %v239_v3 = vld [vmem:[#allocation2 + $0x38] sm:$0xff]  ;;  %v238_v4 = vld [vmem:[#allocation2 + $0x30] sm:$0xff]  ;;  %v237_v5 = vld [vmem:[#allocation2 + $0x28] sm:$0xff]  ;;  %vm241_vm1 = vcmask 523264   ;;  %s209_s19 = sand.u32 1, %s635_s13   ;;  %s442_s27 = sshll.u32 %s643_s15, 7 }
  0x27   : > { %s213_s8 = scalar_select %p212_p12, %s643_s15, 1  ;;  %470 = vmatprep.mubr.msk.f32.mxu0 %vm658_vm0, %v657_v1  ;;  %455 = vmatpush3.msra.mxu0 %v239_v3  ;;  %v236_v6 = vld [vmem:[#allocation2 + $0x20] sm:$0xff]  ;;  %v235_v7 = vld [vmem:[#allocation2 + $0x18] sm:$0xff]  ;;  %v234_v8 = vld [vmem:[#allocation2 + $0x10] sm:$0xff]  ;;  %v225_v12 = vand.u32 127, %v224_v11 }
  0x28   : > { %456 = vmatprep.subr.mxu0 %v657_v1  ;;  %v233_v9 = vld [vmem:[#allocation2 + $0x8] sm:$0xff]  ;;  %v232_v10 = vld [vmem:[#allocation2] sm:$0xff]  ;;  %s437_s21 = sshll.u32 %s209_s19, 3  ;;  %s769_s5 = scalar_lea.hbm %s812_s3, %s442_s27 }
  0x29   : > { %s438_s9 = sshll.u32 %s213_s8, 3  ;;  %457 = vmatpush3.msra.mxu0 %v238_v4  ;;  %v240_v15 = vld [vmem:[%s811_s2] sm:$0xff]  ;;  %s211_s28 = scalar_lea.vmem [#allocation5], %s437_s21 }
  0x2a   : > { %s218_s18 = scalar_lea.vmem %s809_s0, %s438_s9  ;;  %458 = vmatprep.subr.mxu0 %v657_v1  ;;  %s331_s29 = sshll.u32 %s211_s28, 4  ;;  %s332_s29 = int_to_ptr.vmem [resolvable:$true] %s331_s29 }
  0x2b   : > { %v223_v2 = vld [vmem:[%s218_s18] sm:$0xff]  ;;  %459 = vmatpush3.msra.mxu0 %v237_v5  ;;  %s317_s6 = scalar_lea.sflag [#allocation4], %s209_s19  ;;  %s571_s7 = scalar_lea.vmem %s332_s29, 128 }
  0x2c   : > { %227 = vperm.xlu0 %544, %v223_v2   ;;  %460 = vmatprep.subr.mxu0 %v657_v1  ;;  %p572_p10 = scmp.ne.s32.totalorder %s332_s29, %s571_s7  ;;  %s659_s8 = smov [#allocation5]  }
  0x2d   : > { %461 = vmatpush3.msra.mxu0 %v236_v6  ;;  %s575_s15 = sshll.u32 %s659_s8, 4  ;;  %s576_s15 = int_to_ptr.vmem [resolvable:$false] %s575_s15 }
  0x2e   : > { %462 = vmatprep.subr.mxu0 %v657_v1  ;;  %p573_p11 = pnand %p572_p10, %p720_p4  ;;  %s577_s9 = scalar_lea.vmem %s576_s15, 256 }
  0x2f   : > { %463 = vmatpush3.msra.mxu0 %v235_v7  ;;  %p578_p0 = scmp.lt.s32.totalorder %s332_s29, %s576_s15  ;;  %p579_p1 = scmp.lt.s32.totalorder %s577_s9, %s571_s7 }
  0x30   : > { %464 = vmatprep.subr.mxu0 %v657_v1  ;;  %p574_p13 = pneg %p573_p11 }
  0x31   : > { %465 = vmatpush3.msra.mxu0 %v234_v8  ;;  %p580_p2 = por %p579_p1, %p578_p0 }
  0x32   : > { %466 = vmatprep.subr.mxu0 %v657_v1 }
  0x33   : > { %467 = vmatpush3.msra.mxu0 %v233_v9  ;;  %p581_p3 = pnand %p580_p2, %p574_p13 }
  0x34   : > { %468 = vmatprep.subr.mxu0 %v657_v1 }
  0x35   : > { %469 = vmatpush3.msra.mxu0 %v232_v10 }
  0xa7   : > { %v228_v13 = vpop.permute.xlu0 %227 }
  0xa8   : > { %vm229_vm2 = vcmp.eq.s32.totalorder %v228_v13, %v225_v12 }
  0xa9   : > { %v439_v14 = vsel %vm229_vm2, 1.0, %v657_v1 }
  0xaa   : > { %471 = vmatmul.mubr.msk.f32.vlgmr.msra.gmra.mxu0 %vm241_vm1, %v439_v14 }
 0x16a   : > { %v311_v16 = vpop.f32.mrf.mxu0 }
 0x16b   : > { %v312_v17 = vadd.f32 %v311_v16, %v240_v15 }
 0x16c   : > { %v472_v18 = vpop.f32.mrf.mxu0 }
 0x16d   : > { %315 = vst [vmem:[%s211_s28] sm:$0xff] %v312_v17 }
 0x16e   : > { %584 = shalt.err (!%p581_p3)
}
 0x16f   : > { %s585_s10 = scalar_lea.hbm %s769_s5, 128  ;;  %s589_s19 = scalar_lea.hbm %s812_s3, 256 }
 0x170   : > { %p586_p5 = scmp.ne.s32.totalorder %s769_s5, %s585_s10  ;;  %p590_p9 = scmp.lt.s32.totalorder %s769_s5, %s812_s3 }
 0x171   : > { %p591_p12 = scmp.lt.s32.totalorder %s589_s19, %s585_s10 }
 0x172   : > { %p587_p6 = pnand %p586_p5, %p720_p4 }
 0x173   : > { %p592_p10 = por %p591_p12, %p590_p9 }
 0x174   : > { %p588_p7 = pneg %p587_p6 }
 0x176   : > { %p593_p11 = pnand %p592_p10, %p588_p7 }
 0x178   : > { %596 = shalt.err (!%p593_p11)
}
 0x179   : > { %477 = dma.vmem_to_hbm [thread:$0]  (%p720_p4), %s332_s29, 128, %s769_s5, %s317_s6  }
 0x17a PF: > { %p489_p13 = scmp.ge.s32.totalorder %s651_s17, 2  ;;  %s343_s26 = sand.u32 1, %s631_s12  }
 0x17b   : > { %s344_s27 = scalar_lea.sflag [#allocation4], %s343_s26 }
 0x17c   : > { %p484_p0 = pnand %p489_p13, %p727_p8 }
 0x17e   : > { %p485_p1 = pneg %p484_p0 }
 0x180   : > { %626 = dma.done.wait (%p485_p1), %s344_s27, 128  }
 0x181   : > { %628 = vsyncadd (%p485_p1), %s344_s27, 4294967168  ;;  %s17_s17 = sadd.s32 1, %s651_s17   ;;  %s817_s12 = smov %s635_s13 }
 0x182   : > { %p14_p2 = scmp.ge.s32.totalorder %s17_s17, 4   ;;  %s818_s13 = smov %s639_s14 }
 0x183   : > { %s819_s14 = smov %s733_s25  ;;  %s820_s15 = smov %s647_s16 }
 0x184   : > { %s821_s16 = smov %s823_s20  ;;  %16 = sbr.rel (!%p14_p2) target bundleno = 5 (0x5), region = 75 }
 0x189   :  { %349 = vsyncpa [#allocation3], 1 }
 0x18a   :  { %351 = vsyncpa [#allocation3 + $0x1], 1 }
 0x18b   :  { %352 = vsyncpa [#allocation4], 1 }
 0x18c   :  { %354 = vsyncpa [#allocation4 + $0x1], 1 }

</bundles_post_ra>
